<compile_context>
chip_gen: v5e
topology: v5e:2x2
jax: 0.10.0
libtpu: 0.0.40
codegen_flags: <defaults>
</compile_context>

<pallas_src>
import jax
import jax.numpy as jnp
from jax.experimental import pallas as pl
from jax.experimental.pallas import tpu as pltpu

VOCAB = 128       # pretrained_lm.config.vocab_size (small synthetic vocab)
H_DIM = 32        # hidden dim of the stand-in models
GM_DIM = 16       # graph-model input feature dim
EOS_ID = VOCAB - 1
_IGNORE = -100
_MAX_ROW_TILE = 512   # 512x128 f32 tile (256 KiB x 2 bufs) fits v7x's 64 MiB VMEM easily


def _round_up(x, m):
    return (x + m - 1) // m * m


def _row_tiling(n_rows, max_tile=_MAX_ROW_TILE):
    padded = _round_up(max(n_rows, 1), 8)
    tile = min(max_tile, padded)
    padded = _round_up(padded, tile)
    return padded, tile


def _log_softmax(z):
    m = jnp.max(z, axis=-1, keepdims=True)
    return z - (jnp.log(jnp.sum(jnp.exp(z - m), axis=-1, keepdims=True)) + m)


def _pick_label_col(mat, labels):
    """Per-row value of `mat` at integer column `labels` via iota-compare.

    Returns (picked (T,1), valid mask as f32 (T,1))."""
    valid = labels != _IGNORE                                 # (T, 1) bool
    safe = jnp.where(valid, labels, 0)
    col = jax.lax.broadcasted_iota(jnp.int32, mat.shape, 1)
    picked = jnp.sum(jnp.where(col == safe, mat, 0.0),
                     axis=-1, keepdims=True)                  # (T, 1)
    return picked, valid.astype(jnp.float32)


_COMPILER_PARAMS = pltpu.CompilerParams(
    dimension_semantics=("arbitrary",),          # row axis carries scalar accumulators
    vmem_limit_bytes=32 * 1024 * 1024,
)


# ---------------------------------------------------------------------------
# Kernel A: LM head + shifted-CE loss (GPT-2 stand-in hot path)
# ---------------------------------------------------------------------------
def _lm_head_kernel(x_ref, w_ref, b_ref, tgt_ref,
                    logits_ref, nll_sum_ref, valid_sum_ref):
    i = pl.program_id(0)

    @pl.when(i == 0)
    def _init():
        nll_sum_ref[...] = jnp.zeros_like(nll_sum_ref)
        valid_sum_ref[...] = jnp.zeros_like(valid_sum_ref)

    logits = jnp.dot(x_ref[...], w_ref[...],
                     preferred_element_type=jnp.float32) + b_ref[...]
    logits_ref[...] = logits

    # NLL = logsumexp(logits) - logits[label]; avoids materializing a full
    # (T, V) log-softmax just to pick one column per row.
    m = jnp.max(logits, axis=-1, keepdims=True)
    lse = jnp.log(jnp.sum(jnp.exp(logits - m), axis=-1, keepdims=True)) + m
    picked, validf = _pick_label_col(logits, tgt_ref[...])
    nll_sum_ref[...] += jnp.sum((lse - picked) * validf, axis=0, keepdims=True)
    valid_sum_ref[...] += jnp.sum(validf, axis=0, keepdims=True)


def lm_head_and_loss(x_bf16, w_bf16, b_f32, targets):
    n, h = x_bf16.shape
    v = w_bf16.shape[1]
    padded, tile = _row_tiling(n)
    if padded != n:
        pad = padded - n
        x_bf16 = jnp.pad(x_bf16, ((0, pad), (0, 0)))
        targets = jnp.pad(targets, ((0, pad), (0, 0)), constant_values=_IGNORE)

    logits, nll_sum, valid_sum = pl.pallas_call(
        _lm_head_kernel,
        out_shape=(jax.ShapeDtypeStruct((padded, v), jnp.float32),
                   jax.ShapeDtypeStruct((1, 1), jnp.float32),
                   jax.ShapeDtypeStruct((1, 1), jnp.float32)),
        grid_spec=pltpu.PrefetchScalarGridSpec(
            num_scalar_prefetch=0,
            grid=(padded // tile,),
            in_specs=[pl.BlockSpec((tile, h), lambda i: (i, 0)),
                      pl.BlockSpec((h, v), lambda i: (0, 0)),
                      pl.BlockSpec((1, v), lambda i: (0, 0)),
                      pl.BlockSpec((tile, 1), lambda i: (i, 0))],
            out_specs=[pl.BlockSpec((tile, v), lambda i: (i, 0)),
                       pl.BlockSpec((1, 1), lambda i: (0, 0)),
                       pl.BlockSpec((1, 1), lambda i: (0, 0))]),
        compiler_params=_COMPILER_PARAMS,
    )(x_bf16, w_bf16, b_f32.reshape(1, v), targets)
    return logits[:n], nll_sum[0, 0], valid_sum[0, 0]


# ---------------------------------------------------------------------------
# Kernel B: fused graph MLP + log_softmax(p,q) + Bhattacharyya + masked NLL
# ---------------------------------------------------------------------------
def _graph_combine_kernel(x_ref, w1_ref, b1_ref, w2_ref, b2_ref,
                          lm_ref, lab_ref,
                          gm_logits_ref, nll_sum_ref, bd_sum_ref,
                          valid_sum_ref):
    i = pl.program_id(0)

    @pl.when(i == 0)
    def _init():
        nll_sum_ref[...] = jnp.zeros_like(nll_sum_ref)
        bd_sum_ref[...] = jnp.zeros_like(bd_sum_ref)
        valid_sum_ref[...] = jnp.zeros_like(valid_sum_ref)

    # 2-layer graph MLP; hidden activations never leave the core.
    h = jnp.dot(x_ref[...], w1_ref[...],
                preferred_element_type=jnp.float32) + b1_ref[...]
    h = jnp.maximum(h, 0.0)
    gm_logits = jnp.dot(h.astype(jnp.bfloat16), w2_ref[...],
                        preferred_element_type=jnp.float32) + b2_ref[...]
    gm_logits_ref[...] = gm_logits

    q = _log_softmax(gm_logits)            # graph-model log-softmax
    p = _log_softmax(lm_ref[...])          # gathered pretrained-LM rows

    lab = lab_ref[...]
    picked, validf = _pick_label_col(q, lab)
    nll_sum_ref[...] += jnp.sum(-picked * validf, axis=0, keepdims=True)

    # Bhattacharyya distance between clamped log-distributions:
    #   sqrt(exp(p + q)) == exp(0.5 * (p + q))   (single EUP exp per element)
    pc = jnp.maximum(p, -40.0)
    qc = jnp.maximum(q, -40.0)
    coeff = jnp.sum(jnp.exp(0.5 * (pc + qc)), axis=-1, keepdims=True)
    bd = -jnp.log(coeff)
    bd_sum_ref[...] += jnp.sum(bd * validf, axis=0, keepdims=True)
    valid_sum_ref[...] += jnp.sum(validf, axis=0, keepdims=True)


def graph_combine(gm_x_bf16, w1, b1, w2, b2, lm_rows, labels):
    n = gm_x_bf16.shape[0]
    padded, tile = _row_tiling(n)
    if padded != n:
        pad = padded - n
        gm_x_bf16 = jnp.pad(gm_x_bf16, ((0, pad), (0, 0)))
        lm_rows = jnp.pad(lm_rows, ((0, pad), (0, 0)))
        labels = jnp.pad(labels, ((0, pad), (0, 0)), constant_values=_IGNORE)

    gm_logits, nll_sum, bd_sum, valid_sum = pl.pallas_call(
        _graph_combine_kernel,
        out_shape=(jax.ShapeDtypeStruct((padded, VOCAB), jnp.float32),
                   jax.ShapeDtypeStruct((1, 1), jnp.float32),
                   jax.ShapeDtypeStruct((1, 1), jnp.float32),
                   jax.ShapeDtypeStruct((1, 1), jnp.float32)),
        grid_spec=pltpu.PrefetchScalarGridSpec(
            num_scalar_prefetch=0,
            grid=(padded // tile,),
            in_specs=[pl.BlockSpec((tile, GM_DIM), lambda i: (i, 0)),
                      pl.BlockSpec((GM_DIM, H_DIM), lambda i: (0, 0)),
                      pl.BlockSpec((1, H_DIM), lambda i: (0, 0)),
                      pl.BlockSpec((H_DIM, VOCAB), lambda i: (0, 0)),
                      pl.BlockSpec((1, VOCAB), lambda i: (0, 0)),
                      pl.BlockSpec((tile, VOCAB), lambda i: (i, 0)),
                      pl.BlockSpec((tile, 1), lambda i: (i, 0))],
            out_specs=[pl.BlockSpec((tile, VOCAB), lambda i: (i, 0)),
                       pl.BlockSpec((1, 1), lambda i: (0, 0)),
                       pl.BlockSpec((1, 1), lambda i: (0, 0)),
                       pl.BlockSpec((1, 1), lambda i: (0, 0))]),
        compiler_params=_COMPILER_PARAMS,
    )(gm_x_bf16, w1, b1.reshape(1, H_DIM), w2, b2.reshape(1, VOCAB),
      lm_rows, labels)
    return gm_logits[:n], nll_sum[0, 0], bd_sum[0, 0], valid_sum[0, 0]


# ---------------------------------------------------------------------------
# Parameters (deterministic, synthetic)
# ---------------------------------------------------------------------------
def init_params(key):
    ks = jax.random.split(key, 4)
    return dict(
        emb=0.02 * jax.random.normal(ks[0], (VOCAB, H_DIM), jnp.float32),
        w_lm=0.02 * jax.random.normal(ks[1], (H_DIM, VOCAB), jnp.float32),
        b_lm=jnp.zeros((VOCAB,), jnp.float32),
        w1=0.2 * jax.random.normal(ks[2], (GM_DIM, H_DIM), jnp.float32),
        b1=jnp.zeros((H_DIM,), jnp.float32),
        w2=0.2 * jax.random.normal(ks[3], (H_DIM, VOCAB), jnp.float32),
        b2=jnp.zeros((VOCAB,), jnp.float32),
    )


# ---------------------------------------------------------------------------
# RegularizedLM forward
# ---------------------------------------------------------------------------
@jax.jit
def regularized_lm_forward(params, plm_inputs, gm_inputs, plm_gm_tokens,
                           lbda=0.5):
    B, S = plm_inputs.shape
    G = plm_gm_tokens.shape[1]

    plm_labels = plm_inputs                                   # clone semantics
    plm_in = jnp.where(plm_inputs == _IGNORE, 0, plm_inputs)  # inputs[==-100]=0

    # ---- pretrained LM (GPT-2 stand-in: embedding + LM head in Pallas) ----
    x = params["emb"][plm_in].reshape(B * S, H_DIM).astype(jnp.bfloat16)

    # Shifted-CE targets (ignore_index=-100): row (b, s) predicts labels[b, s+1].
    tgt = jnp.full((B, S), _IGNORE, jnp.int32)
    tgt = tgt.at[:, :-1].set(plm_labels[:, 1:])
    tgt = tgt.reshape(B * S, 1)

    plm_logits, lm_nll_sum, lm_valid_sum = lm_head_and_loss(
        x, params["w_lm"].astype(jnp.bfloat16), params["b_lm"], tgt)
    lm_loss = lm_nll_sum / jnp.maximum(lm_valid_sum, 1.0)
    plm_logits = plm_logits.reshape(B, S, VOCAB)

    # gm_labels = gather(plm_labels, 1, plm_gm_tokens); eos -> ignore (static mask)
    gm_labels = jnp.take_along_axis(plm_labels, plm_gm_tokens, axis=1)
    gm_labels = jnp.where(gm_labels == EOS_ID, _IGNORE, gm_labels)
    gm_labels = gm_labels.reshape(B * G, 1).astype(jnp.int32)

    # p-rows: gather plm_logits at clamp_min(plm_gm_tokens - 1, 0).
    idx = jnp.maximum(plm_gm_tokens - 1, 0)
    lm_rows = jnp.take_along_axis(plm_logits, idx[:, :, None], axis=1)
    lm_rows = lm_rows.reshape(B * G, VOCAB)

    gm_x = gm_inputs.reshape(B * G, GM_DIM).astype(jnp.bfloat16)

    # ---- fused graph MLP + combine hot path (single Pallas kernel) ----
    gm_logits, gm_nll_sum, bd_sum, gm_valid_sum = graph_combine(
        gm_x, params["w1"].astype(jnp.bfloat16), params["b1"],
        params["w2"].astype(jnp.bfloat16), params["b2"],
        lm_rows, gm_labels)

    denom = jnp.maximum(gm_valid_sum, 1.0)
    gm_loss = gm_nll_sum / denom        # graph-model NLL (masked mean)
    pr_loss = bd_sum / denom            # mean Bhattacharyya distance (masked)
    loss = lm_loss + gm_loss + lbda * pr_loss

    return dict(
        logits=lm_rows.reshape(B, G, VOCAB),   # gather(plm_logits, clamp(tokens-1,0))
        loss=loss,
        aux_loss=pr_loss,
        lm_loss=lm_loss,
        gm_loss=gm_loss,
        gm_logits=gm_logits.reshape(B, G, VOCAB),
    )


# ---------------------------------------------------------------------------
if __name__ == "__main__":
    B, S, G = 2, 8, 4
    key = jax.random.PRNGKey(0)
    kp, ki, kg = jax.random.split(key, 3)
    params = init_params(kp)

    plm_inputs = jax.random.randint(ki, (B, S), 0, VOCAB - 1, dtype=jnp.int32)
    plm_inputs = plm_inputs.at[1, S - 1].set(-100)   # padded position
    plm_inputs = plm_inputs.at[0, 2].set(EOS_ID)     # gathered eos -> masked graph label
    plm_gm_tokens = jnp.array([[1, 2, 4, 6], [0, 3, 5, 6]], dtype=jnp.int32)
    gm_inputs = jax.random.normal(kg, (B, G, GM_DIM), jnp.float32)

    result = regularized_lm_forward(params, plm_inputs, gm_inputs, plm_gm_tokens,
                                    lbda=0.5)
    jax.block_until_ready(result["loss"])
    jax.block_until_ready(result["logits"])
    print("KERNEL_OK")
</pallas_src>

<mosaic_0001>
module attributes {stable_mosaic.version = 11 : i64} {
  func.func @_lm_head_kernel(%arg0: i32, %arg1: memref<16x32xbf16, #tpu.memory_space<vmem>>, %arg2: memref<32x128xbf16, #tpu.memory_space<vmem>>, %arg3: memref<1x128xf32, #tpu.memory_space<vmem>>, %arg4: memref<16x1xi32, #tpu.memory_space<vmem>>, %arg5: memref<16x128xf32, #tpu.memory_space<vmem>>, %arg6: memref<1x1xf32, #tpu.memory_space<vmem>>, %arg7: memref<1x1xf32, #tpu.memory_space<vmem>>) attributes {dimension_semantics = [#tpu.dimension_semantics<arbitrary>], iteration_bounds = array<i64: 1>, scalar_prefetch = 0 : i64, scratch_operands = 0 : i64, tpu.core_type = #tpu.core_type<tc>, window_params = [{transform_indices = @transform_0, window_bounds = array<i64: 16, 32>}, {pipeline_mode = #tpu.pipeline_mode<synchronous>, transform_indices = @transform_1, window_bounds = array<i64: 32, 128>}, {pipeline_mode = #tpu.pipeline_mode<synchronous>, transform_indices = @transform_2, window_bounds = array<i64: 1, 128>}, {transform_indices = @transform_3, window_bounds = array<i64: 16, 1>}, {transform_indices = @transform_4, window_bounds = array<i64: 16, 128>}, {pipeline_mode = #tpu.pipeline_mode<synchronous>, transform_indices = @transform_5, window_bounds = array<i64: 1, 1>}, {pipeline_mode = #tpu.pipeline_mode<synchronous>, transform_indices = @transform_6, window_bounds = array<i64: 1, 1>}]} {
    %c0_i32 = arith.constant 0 : i32
    %0 = arith.cmpi eq, %arg0, %c0_i32 : i32
    %1 = arith.extui %0 : i1 to i32
    %c0_i32_0 = arith.constant 0 : i32
    %2 = arith.cmpi ne, %1, %c0_i32_0 : i32
    scf.if %2 {
      %cst_25 = arith.constant 0.000000e+00 : f32
      %45 = vector.broadcast %cst_25 : f32 to vector<1x1xf32>
      %c0_26 = arith.constant 0 : index
      %c0_27 = arith.constant 0 : index
      %46 = vector.load %arg6[%c0_26, %c0_27] : memref<1x1xf32, #tpu.memory_space<vmem>>, vector<1x1xf32>
      tpu.vector_store %arg6[%c0_26, %c0_27], %45 {strides = array<i32>} : memref<1x1xf32, #tpu.memory_space<vmem>>, vector<1x1xf32>,
      %cst_28 = arith.constant 0.000000e+00 : f32
      %47 = vector.broadcast %cst_28 : f32 to vector<1x1xf32>
      %c0_29 = arith.constant 0 : index
      %c0_30 = arith.constant 0 : index
      %48 = vector.load %arg7[%c0_29, %c0_30] : memref<1x1xf32, #tpu.memory_space<vmem>>, vector<1x1xf32>
      tpu.vector_store %arg7[%c0_29, %c0_30], %47 {strides = array<i32>} : memref<1x1xf32, #tpu.memory_space<vmem>>, vector<1x1xf32>,
    } else {
    }
    %c0 = arith.constant 0 : index
    %c0_1 = arith.constant 0 : index
    %3 = vector.load %arg1[%c0, %c0_1] : memref<16x32xbf16, #tpu.memory_space<vmem>>, vector<16x32xbf16>
    %c0_2 = arith.constant 0 : index
    %c0_3 = arith.constant 0 : index
    %4 = vector.load %arg2[%c0_2, %c0_3] : memref<32x128xbf16, #tpu.memory_space<vmem>>, vector<32x128xbf16>
    %cst = arith.constant dense<0.000000e+00> : vector<16x128xf32>
    %5 = tpu.matmul %3, %4, %cst {dimension_numbers = #tpu.dot_dimension_numbers<[1], [0], [0], [1], [0, 0, 1, 1], [], []>} : vector<16x32xbf16>, vector<32x128xbf16>, vector<16x128xf32> -> vector<16x128xf32>
    %c0_4 = arith.constant 0 : index
    %c0_5 = arith.constant 0 : index
    %6 = vector.load %arg3[%c0_4, %c0_5] : memref<1x128xf32, #tpu.memory_space<vmem>>, vector<1x128xf32>
    %7 = vector.broadcast %6 : vector<1x128xf32> to vector<16x128xf32>
    %8 = arith.addf %5, %7 : vector<16x128xf32>
    %c0_6 = arith.constant 0 : index
    %c0_7 = arith.constant 0 : index
    %9 = vector.load %arg5[%c0_6, %c0_7] : memref<16x128xf32, #tpu.memory_space<vmem>>, vector<16x128xf32>
    tpu.vector_store %arg5[%c0_6, %c0_7], %8 {strides = array<i32>} : memref<16x128xf32, #tpu.memory_space<vmem>>, vector<16x128xf32>,
    %cst_8 = arith.constant dense<0xFF800000> : vector<16xf32>
    %10 = vector.multi_reduction <maximumf>, %8, %cst_8 [1] : vector<16x128xf32> to vector<16xf32>
    %11 = vector.shape_cast %10 : vector<16xf32> to vector<16x1xf32>
    %12 = vector.broadcast %11 : vector<16x1xf32> to vector<16x128xf32>
    %13 = arith.subf %8, %12 : vector<16x128xf32>
    %14 = math.exp %13 : vector<16x128xf32>
    %cst_9 = arith.constant dense<0.000000e+00> : vector<16xf32>
    %15 = vector.multi_reduction <add>, %14, %cst_9 [1] : vector<16x128xf32> to vector<16xf32>
    %16 = vector.shape_cast %15 : vector<16xf32> to vector<16x1xf32>
    %17 = math.log %16 : vector<16x1xf32>
    %18 = arith.addf %17, %11 : vector<16x1xf32>
    %c0_10 = arith.constant 0 : index
    %c0_11 = arith.constant 0 : index
    %19 = vector.load %arg4[%c0_10, %c0_11] : memref<16x1xi32, #tpu.memory_space<vmem>>, vector<16x1xi32>
    %c-100_i32 = arith.constant -100 : i32
    %20 = vector.broadcast %c-100_i32 : i32 to vector<16x1xi32>
    %21 = arith.cmpi ne, %19, %20 : vector<16x1xi32>
    %c0_i32_12 = arith.constant 0 : i32
    %22 = vector.broadcast %c0_i32_12 : i32 to vector<16x1xi32>
    %23 = arith.select %21, %19, %22 : vector<16x1xi1>, vector<16x1xi32>
    %24 = tpu.iota {dimensions = array<i32: 1>} : vector<16x128xi32>
    %25 = vector.broadcast %23 : vector<16x1xi32> to vector<16x128xi32>
    %26 = arith.cmpi eq, %24, %25 : vector<16x128xi32>
    %cst_13 = arith.constant 0.000000e+00 : f32
    %27 = vector.broadcast %cst_13 : f32 to vector<16x128xf32>
    %28 = arith.select %26, %8, %27 : vector<16x128xi1>, vector<16x128xf32>
    %cst_14 = arith.constant dense<0.000000e+00> : vector<16xf32>
    %29 = vector.multi_reduction <add>, %28, %cst_14 [1] : vector<16x128xf32> to vector<16xf32>
    %30 = vector.shape_cast %29 : vector<16xf32> to vector<16x1xf32>
    %31 = arith.extui %21 : vector<16x1xi1> to vector<16x1xi32>
    %32 = arith.sitofp %31 : vector<16x1xi32> to vector<16x1xf32>
    %c0_15 = arith.constant 0 : index
    %c0_16 = arith.constant 0 : index
    %33 = vector.load %arg6[%c0_15, %c0_16] : memref<1x1xf32, #tpu.memory_space<vmem>>, vector<1x1xf32>
    %34 = arith.subf %18, %30 : vector<16x1xf32>
    %35 = arith.mulf %34, %32 : vector<16x1xf32>
    %cst_17 = arith.constant dense<0.000000e+00> : vector<1xf32>
    %36 = vector.multi_reduction <add>, %35, %cst_17 [0] : vector<16x1xf32> to vector<1xf32>
    %37 = vector.shape_cast %36 : vector<1xf32> to vector<1x1xf32>
    %38 = arith.addf %33, %37 : vector<1x1xf32>
    %c0_18 = arith.constant 0 : index
    %c0_19 = arith.constant 0 : index
    %39 = vector.load %arg6[%c0_18, %c0_19] : memref<1x1xf32, #tpu.memory_space<vmem>>, vector<1x1xf32>
    tpu.vector_store %arg6[%c0_18, %c0_19], %38 {strides = array<i32>} : memref<1x1xf32, #tpu.memory_space<vmem>>, vector<1x1xf32>,
    %c0_20 = arith.constant 0 : index
    %c0_21 = arith.constant 0 : index
    %40 = vector.load %arg7[%c0_20, %c0_21] : memref<1x1xf32, #tpu.memory_space<vmem>>, vector<1x1xf32>
    %cst_22 = arith.constant dense<0.000000e+00> : vector<1xf32>
    %41 = vector.multi_reduction <add>, %32, %cst_22 [0] : vector<16x1xf32> to vector<1xf32>
    %42 = vector.shape_cast %41 : vector<1xf32> to vector<1x1xf32>
    %43 = arith.addf %40, %42 : vector<1x1xf32>
    %c0_23 = arith.constant 0 : index
    %c0_24 = arith.constant 0 : index
    %44 = vector.load %arg7[%c0_23, %c0_24] : memref<1x1xf32, #tpu.memory_space<vmem>>, vector<1x1xf32>
    tpu.vector_store %arg7[%c0_23, %c0_24], %43 {strides = array<i32>} : memref<1x1xf32, #tpu.memory_space<vmem>>, vector<1x1xf32>,
    return
  }
  func.func @transform_0(%arg0: i32) -> (i32, i32) {
    %c0_i32 = arith.constant 0 : i32
    %c0_i32_0 = arith.constant 0 : i32
    return %arg0, %c0_i32 : i32, i32
  }
  func.func @transform_1(%arg0: i32) -> (i32, i32) {
    %c0_i32 = arith.constant 0 : i32
    %c0_i32_0 = arith.constant 0 : i32
    %c0_i32_1 = arith.constant 0 : i32
    return %c0_i32, %c0_i32_0 : i32, i32
  }
  func.func @transform_2(%arg0: i32) -> (i32, i32) {
    %c0_i32 = arith.constant 0 : i32
    %c0_i32_0 = arith.constant 0 : i32
    %c0_i32_1 = arith.constant 0 : i32
    return %c0_i32, %c0_i32_0 : i32, i32
  }
  func.func @transform_3(%arg0: i32) -> (i32, i32) {
    %c0_i32 = arith.constant 0 : i32
    %c0_i32_0 = arith.constant 0 : i32
    return %arg0, %c0_i32 : i32, i32
  }
  func.func @transform_4(%arg0: i32) -> (i32, i32) {
    %c0_i32 = arith.constant 0 : i32
    %c0_i32_0 = arith.constant 0 : i32
    return %arg0, %c0_i32 : i32, i32
  }
  func.func @transform_5(%arg0: i32) -> (i32, i32) {
    %c0_i32 = arith.constant 0 : i32
    %c0_i32_0 = arith.constant 0 : i32
    %c0_i32_1 = arith.constant 0 : i32
    return %c0_i32, %c0_i32_0 : i32, i32
  }
  func.func @transform_6(%arg0: i32) -> (i32, i32) {
    %c0_i32 = arith.constant 0 : i32
    %c0_i32_0 = arith.constant 0 : i32
    %c0_i32_1 = arith.constant 0 : i32
    return %c0_i32, %c0_i32_0 : i32, i32
  }
}

module attributes {stable_mosaic.version = 11 : i64} {
  func.func @_graph_combine_kernel(%arg0: i32, %arg1: memref<8x16xbf16, #tpu.memory_space<vmem>>, %arg2: memref<16x32xbf16, #tpu.memory_space<vmem>>, %arg3: memref<1x32xf32, #tpu.memory_space<vmem>>, %arg4: memref<32x128xbf16, #tpu.memory_space<vmem>>, %arg5: memref<1x128xf32, #tpu.memory_space<vmem>>, %arg6: memref<8x128xf32, #tpu.memory_space<vmem>>, %arg7: memref<8x1xi32, #tpu.memory_space<vmem>>, %arg8: memref<8x128xf32, #tpu.memory_space<vmem>>, %arg9: memref<1x1xf32, #tpu.memory_space<vmem>>, %arg10: memref<1x1xf32, #tpu.memory_space<vmem>>, %arg11: memref<1x1xf32, #tpu.memory_space<vmem>>) attributes {dimension_semantics = [#tpu.dimension_semantics<arbitrary>], iteration_bounds = array<i64: 1>, scalar_prefetch = 0 : i64, scratch_operands = 0 : i64, tpu.core_type = #tpu.core_type<tc>, window_params = [{transform_indices = @transform_0, window_bounds = array<i64: 8, 16>}, {pipeline_mode = #tpu.pipeline_mode<synchronous>, transform_indices = @transform_1, window_bounds = array<i64: 16, 32>}, {pipeline_mode = #tpu.pipeline_mode<synchronous>, transform_indices = @transform_2, window_bounds = array<i64: 1, 32>}, {pipeline_mode = #tpu.pipeline_mode<synchronous>, transform_indices = @transform_3, window_bounds = array<i64: 32, 128>}, {pipeline_mode = #tpu.pipeline_mode<synchronous>, transform_indices = @transform_4, window_bounds = array<i64: 1, 128>}, {transform_indices = @transform_5, window_bounds = array<i64: 8, 128>}, {transform_indices = @transform_6, window_bounds = array<i64: 8, 1>}, {transform_indices = @transform_7, window_bounds = array<i64: 8, 128>}, {pipeline_mode = #tpu.pipeline_mode<synchronous>, transform_indices = @transform_8, window_bounds = array<i64: 1, 1>}, {pipeline_mode = #tpu.pipeline_mode<synchronous>, transform_indices = @transform_9, window_bounds = array<i64: 1, 1>}, {pipeline_mode = #tpu.pipeline_mode<synchronous>, transform_indices = @transform_10, window_bounds = array<i64: 1, 1>}]} {
    %c0_i32 = arith.constant 0 : i32
    %0 = arith.cmpi eq, %arg0, %c0_i32 : i32
    %1 = arith.extui %0 : i1 to i32
    %c0_i32_0 = arith.constant 0 : i32
    %2 = arith.cmpi ne, %1, %c0_i32_0 : i32
    scf.if %2 {
      %cst_46 = arith.constant 0.000000e+00 : f32
      %87 = vector.broadcast %cst_46 : f32 to vector<1x1xf32>
      %c0_47 = arith.constant 0 : index
      %c0_48 = arith.constant 0 : index
      %88 = vector.load %arg9[%c0_47, %c0_48] : memref<1x1xf32, #tpu.memory_space<vmem>>, vector<1x1xf32>
      tpu.vector_store %arg9[%c0_47, %c0_48], %87 {strides = array<i32>} : memref<1x1xf32, #tpu.memory_space<vmem>>, vector<1x1xf32>,
      %cst_49 = arith.constant 0.000000e+00 : f32
      %89 = vector.broadcast %cst_49 : f32 to vector<1x1xf32>
      %c0_50 = arith.constant 0 : index
      %c0_51 = arith.constant 0 : index
      %90 = vector.load %arg10[%c0_50, %c0_51] : memref<1x1xf32, #tpu.memory_space<vmem>>, vector<1x1xf32>
      tpu.vector_store %arg10[%c0_50, %c0_51], %89 {strides = array<i32>} : memref<1x1xf32, #tpu.memory_space<vmem>>, vector<1x1xf32>,
      %cst_52 = arith.constant 0.000000e+00 : f32
      %91 = vector.broadcast %cst_52 : f32 to vector<1x1xf32>
      %c0_53 = arith.constant 0 : index
      %c0_54 = arith.constant 0 : index
      %92 = vector.load %arg11[%c0_53, %c0_54] : memref<1x1xf32, #tpu.memory_space<vmem>>, vector<1x1xf32>
      tpu.vector_store %arg11[%c0_53, %c0_54], %91 {strides = array<i32>} : memref<1x1xf32, #tpu.memory_space<vmem>>, vector<1x1xf32>,
    } else {
    }
    %c0 = arith.constant 0 : index
    %c0_1 = arith.constant 0 : index
    %3 = vector.load %arg1[%c0, %c0_1] : memref<8x16xbf16, #tpu.memory_space<vmem>>, vector<8x16xbf16>
    %c0_2 = arith.constant 0 : index
    %c0_3 = arith.constant 0 : index
    %4 = vector.load %arg2[%c0_2, %c0_3] : memref<16x32xbf16, #tpu.memory_space<vmem>>, vector<16x32xbf16>
    %cst = arith.constant dense<0.000000e+00> : vector<8x32xf32>
    %5 = tpu.matmul %3, %4, %cst {dimension_numbers = #tpu.dot_dimension_numbers<[1], [0], [0], [1], [0, 0, 1, 1], [], []>} : vector<8x16xbf16>, vector<16x32xbf16>, vector<8x32xf32> -> vector<8x32xf32>
    %c0_4 = arith.constant 0 : index
    %c0_5 = arith.constant 0 : index
    %6 = vector.load %arg3[%c0_4, %c0_5] : memref<1x32xf32, #tpu.memory_space<vmem>>, vector<1x32xf32>
    %7 = vector.broadcast %6 : vector<1x32xf32> to vector<8x32xf32>
    %8 = arith.addf %5, %7 : vector<8x32xf32>
    %cst_6 = arith.constant 0.000000e+00 : f32
    %9 = vector.broadcast %cst_6 : f32 to vector<8x32xf32>
    %10 = arith.maximumf %8, %9 : vector<8x32xf32>
    %11 = arith.truncf %10 : vector<8x32xf32> to vector<8x32xbf16>
    %c0_7 = arith.constant 0 : index
    %c0_8 = arith.constant 0 : index
    %12 = vector.load %arg4[%c0_7, %c0_8] : memref<32x128xbf16, #tpu.memory_space<vmem>>, vector<32x128xbf16>
    %cst_9 = arith.constant dense<0.000000e+00> : vector<8x128xf32>
    %13 = tpu.matmul %11, %12, %cst_9 {dimension_numbers = #tpu.dot_dimension_numbers<[1], [0], [0], [1], [0, 0, 1, 1], [], []>} : vector<8x32xbf16>, vector<32x128xbf16>, vector<8x128xf32> -> vector<8x128xf32>
    %c0_10 = arith.constant 0 : index
    %c0_11 = arith.constant 0 : index
    %14 = vector.load %arg5[%c0_10, %c0_11] : memref<1x128xf32, #tpu.memory_space<vmem>>, vector<1x128xf32>
    %15 = vector.broadcast %14 : vector<1x128xf32> to vector<8x128xf32>
    %16 = arith.addf %13, %15 : vector<8x128xf32>
    %c0_12 = arith.constant 0 : index
    %c0_13 = arith.constant 0 : index
    %17 = vector.load %arg8[%c0_12, %c0_13] : memref<8x128xf32, #tpu.memory_space<vmem>>, vector<8x128xf32>
    tpu.vector_store %arg8[%c0_12, %c0_13], %16 {strides = array<i32>} : memref<8x128xf32, #tpu.memory_space<vmem>>, vector<8x128xf32>,
    %cst_14 = arith.constant dense<0xFF800000> : vector<8xf32>
    %18 = vector.multi_reduction <maximumf>, %16, %cst_14 [1] : vector<8x128xf32> to vector<8xf32>
    %19 = vector.shape_cast %18 : vector<8xf32> to vector<8x1xf32>
    %20 = vector.broadcast %19 : vector<8x1xf32> to vector<8x128xf32>
    %21 = arith.subf %16, %20 : vector<8x128xf32>
    %22 = math.exp %21 : vector<8x128xf32>
    %cst_15 = arith.constant dense<0.000000e+00> : vector<8xf32>
    %23 = vector.multi_reduction <add>, %22, %cst_15 [1] : vector<8x128xf32> to vector<8xf32>
    %24 = vector.shape_cast %23 : vector<8xf32> to vector<8x1xf32>
    %25 = math.log %24 : vector<8x1xf32>
    %26 = arith.addf %25, %19 : vector<8x1xf32>
    %27 = vector.broadcast %26 : vector<8x1xf32> to vector<8x128xf32>
    %28 = arith.subf %16, %27 : vector<8x128xf32>
    %c0_16 = arith.constant 0 : index
    %c0_17 = arith.constant 0 : index
    %29 = vector.load %arg6[%c0_16, %c0_17] : memref<8x128xf32, #tpu.memory_space<vmem>>, vector<8x128xf32>
    %cst_18 = arith.constant dense<0xFF800000> : vector<8xf32>
    %30 = vector.multi_reduction <maximumf>, %29, %cst_18 [1] : vector<8x128xf32> to vector<8xf32>
    %31 = vector.shape_cast %30 : vector<8xf32> to vector<8x1xf32>
    %32 = vector.broadcast %31 : vector<8x1xf32> to vector<8x128xf32>
    %33 = arith.subf %29, %32 : vector<8x128xf32>
    %34 = math.exp %33 : vector<8x128xf32>
    %cst_19 = arith.constant dense<0.000000e+00> : vector<8xf32>
    %35 = vector.multi_reduction <add>, %34, %cst_19 [1] : vector<8x128xf32> to vector<8xf32>
    %36 = vector.shape_cast %35 : vector<8xf32> to vector<8x1xf32>
    %37 = math.log %36 : vector<8x1xf32>
    %38 = arith.addf %37, %31 : vector<8x1xf32>
    %39 = vector.broadcast %38 : vector<8x1xf32> to vector<8x128xf32>
    %40 = arith.subf %29, %39 : vector<8x128xf32>
    %c0_20 = arith.constant 0 : index
    %c0_21 = arith.constant 0 : index
    %41 = vector.load %arg7[%c0_20, %c0_21] : memref<8x1xi32, #tpu.memory_space<vmem>>, vector<8x1xi32>
    %c-100_i32 = arith.constant -100 : i32
    %42 = vector.broadcast %c-100_i32 : i32 to vector<8x1xi32>
    %43 = arith.cmpi ne, %41, %42 : vector<8x1xi32>
    %c0_i32_22 = arith.constant 0 : i32
    %44 = vector.broadcast %c0_i32_22 : i32 to vector<8x1xi32>
    %45 = arith.select %43, %41, %44 : vector<8x1xi1>, vector<8x1xi32>
    %46 = tpu.iota {dimensions = array<i32: 1>} : vector<8x128xi32>
    %47 = vector.broadcast %45 : vector<8x1xi32> to vector<8x128xi32>
    %48 = arith.cmpi eq, %46, %47 : vector<8x128xi32>
    %cst_23 = arith.constant 0.000000e+00 : f32
    %49 = vector.broadcast %cst_23 : f32 to vector<8x128xf32>
    %50 = arith.select %48, %28, %49 : vector<8x128xi1>, vector<8x128xf32>
    %cst_24 = arith.constant dense<0.000000e+00> : vector<8xf32>
    %51 = vector.multi_reduction <add>, %50, %cst_24 [1] : vector<8x128xf32> to vector<8xf32>
    %52 = vector.shape_cast %51 : vector<8xf32> to vector<8x1xf32>
    %53 = arith.extui %43 : vector<8x1xi1> to vector<8x1xi32>
    %54 = arith.sitofp %53 : vector<8x1xi32> to vector<8x1xf32>
    %c0_25 = arith.constant 0 : index
    %c0_26 = arith.constant 0 : index
    %55 = vector.load %arg9[%c0_25, %c0_26] : memref<1x1xf32, #tpu.memory_space<vmem>>, vector<1x1xf32>
    %cst_27 = arith.constant 0.000000e+00 : f32
    %56 = vector.broadcast %cst_27 : f32 to vector<8x1xf32>
    %57 = arith.subf %56, %52 : vector<8x1xf32>
    %58 = arith.mulf %57, %54 : vector<8x1xf32>
    %cst_28 = arith.constant dense<0.000000e+00> : vector<1xf32>
    %59 = vector.multi_reduction <add>, %58, %cst_28 [0] : vector<8x1xf32> to vector<1xf32>
    %60 = vector.shape_cast %59 : vector<1xf32> to vector<1x1xf32>
    %61 = arith.addf %55, %60 : vector<1x1xf32>
    %c0_29 = arith.constant 0 : index
    %c0_30 = arith.constant 0 : index
    %62 = vector.load %arg9[%c0_29, %c0_30] : memref<1x1xf32, #tpu.memory_space<vmem>>, vector<1x1xf32>
    tpu.vector_store %arg9[%c0_29, %c0_30], %61 {strides = array<i32>} : memref<1x1xf32, #tpu.memory_space<vmem>>, vector<1x1xf32>,
    %cst_31 = arith.constant -4.000000e+01 : f32
    %63 = vector.broadcast %cst_31 : f32 to vector<8x128xf32>
    %64 = arith.maximumf %40, %63 : vector<8x128xf32>
    %cst_32 = arith.constant -4.000000e+01 : f32
    %65 = vector.broadcast %cst_32 : f32 to vector<8x128xf32>
    %66 = arith.maximumf %28, %65 : vector<8x128xf32>
    %67 = arith.addf %64, %66 : vector<8x128xf32>
    %cst_33 = arith.constant 5.000000e-01 : f32
    %68 = vector.broadcast %cst_33 : f32 to vector<8x128xf32>
    %69 = arith.mulf %68, %67 : vector<8x128xf32>
    %70 = math.exp %69 : vector<8x128xf32>
    %cst_34 = arith.constant dense<0.000000e+00> : vector<8xf32>
    %71 = vector.multi_reduction <add>, %70, %cst_34 [1] : vector<8x128xf32> to vector<8xf32>
    %72 = vector.shape_cast %71 : vector<8xf32> to vector<8x1xf32>
    %73 = math.log %72 : vector<8x1xf32>
    %cst_35 = arith.constant 0.000000e+00 : f32
    %74 = vector.broadcast %cst_35 : f32 to vector<8x1xf32>
    %75 = arith.subf %74, %73 : vector<8x1xf32>
    %c0_36 = arith.constant 0 : index
    %c0_37 = arith.constant 0 : index
    %76 = vector.load %arg10[%c0_36, %c0_37] : memref<1x1xf32, #tpu.memory_space<vmem>>, vector<1x1xf32>
    %77 = arith.mulf %75, %54 : vector<8x1xf32>
    %cst_38 = arith.constant dense<0.000000e+00> : vector<1xf32>
    %78 = vector.multi_reduction <add>, %77, %cst_38 [0] : vector<8x1xf32> to vector<1xf32>
    %79 = vector.shape_cast %78 : vector<1xf32> to vector<1x1xf32>
    %80 = arith.addf %76, %79 : vector<1x1xf32>
    %c0_39 = arith.constant 0 : index
    %c0_40 = arith.constant 0 : index
    %81 = vector.load %arg10[%c0_39, %c0_40] : memref<1x1xf32, #tpu.memory_space<vmem>>, vector<1x1xf32>
    tpu.vector_store %arg10[%c0_39, %c0_40], %80 {strides = array<i32>} : memref<1x1xf32, #tpu.memory_space<vmem>>, vector<1x1xf32>,
    %c0_41 = arith.constant 0 : index
    %c0_42 = arith.constant 0 : index
    %82 = vector.load %arg11[%c0_41, %c0_42] : memref<1x1xf32, #tpu.memory_space<vmem>>, vector<1x1xf32>
    %cst_43 = arith.constant dense<0.000000e+00> : vector<1xf32>
    %83 = vector.multi_reduction <add>, %54, %cst_43 [0] : vector<8x1xf32> to vector<1xf32>
    %84 = vector.shape_cast %83 : vector<1xf32> to vector<1x1xf32>
    %85 = arith.addf %82, %84 : vector<1x1xf32>
    %c0_44 = arith.constant 0 : index
    %c0_45 = arith.constant 0 : index
    %86 = vector.load %arg11[%c0_44, %c0_45] : memref<1x1xf32, #tpu.memory_space<vmem>>, vector<1x1xf32>
    tpu.vector_store %arg11[%c0_44, %c0_45], %85 {strides = array<i32>} : memref<1x1xf32, #tpu.memory_space<vmem>>, vector<1x1xf32>,
    return
  }
  func.func @transform_0(%arg0: i32) -> (i32, i32) {
    %c0_i32 = arith.constant 0 : i32
    %c0_i32_0 = arith.constant 0 : i32
    return %arg0, %c0_i32 : i32, i32
  }
  func.func @transform_1(%arg0: i32) -> (i32, i32) {
    %c0_i32 = arith.constant 0 : i32
    %c0_i32_0 = arith.constant 0 : i32
    %c0_i32_1 = arith.constant 0 : i32
    return %c0_i32, %c0_i32_0 : i32, i32
  }
  func.func @transform_2(%arg0: i32) -> (i32, i32) {
    %c0_i32 = arith.constant 0 : i32
    %c0_i32_0 = arith.constant 0 : i32
    %c0_i32_1 = arith.constant 0 : i32
    return %c0_i32, %c0_i32_0 : i32, i32
  }
  func.func @transform_3(%arg0: i32) -> (i32, i32) {
    %c0_i32 = arith.constant 0 : i32
    %c0_i32_0 = arith.constant 0 : i32
    %c0_i32_1 = arith.constant 0 : i32
    return %c0_i32, %c0_i32_0 : i32, i32
  }
  func.func @transform_4(%arg0: i32) -> (i32, i32) {
    %c0_i32 = arith.constant 0 : i32
    %c0_i32_0 = arith.constant 0 : i32
    %c0_i32_1 = arith.constant 0 : i32
    return %c0_i32, %c0_i32_0 : i32, i32
  }
  func.func @transform_5(%arg0: i32) -> (i32, i32) {
    %c0_i32 = arith.constant 0 : i32
    %c0_i32_0 = arith.constant 0 : i32
    return %arg0, %c0_i32 : i32, i32
  }
  func.func @transform_6(%arg0: i32) -> (i32, i32) {
    %c0_i32 = arith.constant 0 : i32
    %c0_i32_0 = arith.constant 0 : i32
    return %arg0, %c0_i32 : i32, i32
  }
  func.func @transform_7(%arg0: i32) -> (i32, i32) {
    %c0_i32 = arith.constant 0 : i32
    %c0_i32_0 = arith.constant 0 : i32
    return %arg0, %c0_i32 : i32, i32
  }
  func.func @transform_8(%arg0: i32) -> (i32, i32) {
    %c0_i32 = arith.constant 0 : i32
    %c0_i32_0 = arith.constant 0 : i32
    %c0_i32_1 = arith.constant 0 : i32
    return %c0_i32, %c0_i32_0 : i32, i32
  }
  func.func @transform_9(%arg0: i32) -> (i32, i32) {
    %c0_i32 = arith.constant 0 : i32
    %c0_i32_0 = arith.constant 0 : i32
    %c0_i32_1 = arith.constant 0 : i32
    return %c0_i32, %c0_i32_0 : i32, i32
  }
  func.func @transform_10(%arg0: i32) -> (i32, i32) {
    %c0_i32 = arith.constant 0 : i32
    %c0_i32_0 = arith.constant 0 : i32
    %c0_i32_1 = arith.constant 0 : i32
    return %c0_i32, %c0_i32_0 : i32, i32
  }
}

</mosaic_0001>

<bundles_post_ra>
// kernel: regularized_lm_forward.2
= control target key start
LH: loop header
LB: loop body
LE: loop exit
PB: predicated region body
PF: predicated region fallthrough
CT: control target
= control target key end

     0   :  { %12 = vsyncpa [#allocation3], 0  ;;  %v274_v1 = vmov 0   ;;  %s359_s0 = inlined_call_operand.vmem [shape: bf16[16,32], index: 0, kind: input, shape index: {}]   ;;  %s360_s1 = inlined_call_operand.vmem [shape: bf16[32,128], index: 1, kind: input, shape index: {}]   ;;  %s361_s2 = inlined_call_operand.vmem [shape: f32[1,128], index: 2, kind: input, shape index: {}]   ;;  %s362_s3 = inlined_call_operand.vmem [shape: s32[16,1], index: 3, kind: input, shape index: {}]   ;;  %s363_s4 = inlined_call_operand.vmem [shape: f32[16,128], index: 4, kind: output, shape index: {0}]   ;;  %s364_s5 = inlined_call_operand.hbm [shape: f32[1,1], index: 5, kind: output, shape index: {1}]   ;;  %s365_s6 = inlined_call_operand.hbm [shape: f32[1,1], index: 6, kind: output, shape index: {2}]  }
   0x1   :  { %v206_v0 = vld [vmem:[%s360_s1 + $0x8] sm:$0xff]  ;;  %211 = vset.pattern.permute.xlu1 %v274_v1  ;;  %v97_v2 = vld [vmem:[%s362_s3] sm:$0xff]  ;;  %212 = vset.pattern.permute.xlu0 %v274_v1 }
   0x2   :  { %v98_v3 = vld [vmem:[%s362_s3 + $0x8] sm:$0xff]  ;;  %67 = vmatpush.bf16.msra.mxu0 %v206_v0  ;;  %v205_v4 = vld [vmem:[%s360_s1] sm:$0xff]  ;;  %vm99_vm0 = vcmp.ne.s32.totalorder %v97_v2, 4294967196 }
   0x3   :  { %vm100_vm1 = vcmp.ne.s32.totalorder %v98_v3, 4294967196 }
   0x4   :  { %13 = vsyncpa [#allocation5], 0  ;;  %v101_v5 = vsel %vm99_vm0, %v97_v2, 0  ;;  %vm128_vm2 = vcmask 7168   ;;  %v275_v6 = vmov 0.0   ;;  %v204_v11 = vld [vmem:[%s359_s0] sm:$0xff]  ;;  %v103_v18 = vlaneseq }
   0x5   :  { %v325_v7 = vsel %vm99_vm0, 1.0, %v275_v6  ;;  %v327_v8 = vsel %vm100_vm1, 1.0, %v275_v6  ;;  %106 = vperm.xlu1 %211, %v101_v5   ;;  %vm57_vm3 = vcmask 261120   ;;  %v102_v13 = vsel %vm100_vm1, %v98_v3, 0  ;;  %v213_v15 = vld [vmem:[%s361_s2] ss:$0 sm:$0xff] }
   0x6   :  { %v142_v9 = vsel %vm128_vm2, %v325_v7, 0.0  ;;  %v143_v10 = vsel %vm128_vm2, %v327_v8, 0.0  ;;  %68 = vmatpush.bf16.msra.mxu0 %v205_v4  ;;  %v104_v20 = vand.u32 127, %v103_v18  ;;  %vm27_vm6 = vcmask 0   ;;  %s276_s2 = smov [#allocation4]   ;;  %s173_s12 = sshll.u32 %s365_s6, 4  ;;  %s174_s12 = int_to_ptr.hbm [resolvable:$true] %s173_s12 }
   0x7   :  { %v144_v12 = vadd.f32 %v143_v10, %v142_v9  ;;  %28 = vst.msk [vmem:[#allocation2] sm:$0x1] %vm27_vm6, %v275_v6  ;;  %s277_s6 = smov [#allocation2]   ;;  %s162_s16 = sshll.u32 %s364_s5, 4  ;;  %s163_s16 = int_to_ptr.hbm [resolvable:$true] %s162_s16 }
   0x8   :  { %29 = vst.msk [vmem:[#allocation4] sm:$0x1] %vm27_vm6, %v275_v6  ;;  %s160_s13 = sshll.u32 %s277_s6, 4  ;;  %s161_s13 = int_to_ptr.vmem [resolvable:$true] %s160_s13 }
   0x9   :  { %201 = vmatmul.msk.bf16.vlgmr.msra.gmra.mxu0 %vm57_vm3, %v204_v11  ;;  %v145_v33 = vrot.slane %v144_v12, 4 }
   0xb   :  { %v146_v34 = vadd.f32 %v145_v33, %v144_v12 }
   0xd   :  { %109 = vperm.xlu1 %211, %v102_v13   ;;  %v147_v35 = vrot.slane %v146_v34, 2 }
   0xe   :  { %v123_v63 = vld [vmem:[#allocation2] sm:$0x1] }
   0xf   :  { %v148_v36 = vadd.f32 %v147_v35, %v146_v34  ;;  %v141_v40 = vld [vmem:[#allocation4] sm:$0x1] }
  0x11   :  { %v149_v38 = vrot.slane %v148_v36, 1 }
  0x13   :  { %v150_v39 = vadd.f32 %v149_v38, %v148_v36 }
  0x15   :  { %v151_v42 = vadd.f32 %v150_v39, %v141_v40 }
  0x17   :  { %152 = vst.msk [vmem:[#allocation4] sm:$0x1] %vm27_vm6, %v151_v42 }
  0x77   :  { %v107_v14 = vpop.permute.xlu1 %106 }
  0x78   :  { %vm111_vm5 = vcmp.eq.s32.totalorder %v104_v20, %v107_v14 }
  0x7f   :  { %v110_v19 = vpop.permute.xlu1 %109 }
  0x80   :  { %vm112_vm4 = vcmp.eq.s32.totalorder %v104_v20, %v110_v19 }
  0x86   :  { %v70_v16 = vpop.f32.mrf.mxu0 }
  0x87   :  { %v71_v17 = vadd.f32 %v213_v15, %v70_v16 }
  0x89   :  { %75 = vst [vmem:[%s363_s4] sm:$0xff] %v71_v17  ;;  %77 = vmax.xlane.f32.xlu0 %v71_v17  ;;  %v113_v24 = vsel %vm111_vm5, %v71_v17, 0.0 }
  0x8e   :  { %v72_v21 = vpop.f32.mrf.mxu0 }
  0x8f   :  { %v73_v22 = vadd.f32 %v213_v15, %v72_v21 }
  0x91   :  { %76 = vst [vmem:[%s363_s4 + $0x8] sm:$0xff] %v73_v22  ;;  %79 = vmax.xlane.f32.xlu0 %v73_v22  ;;  %v114_v23 = vsel %vm112_vm4, %v73_v22, 0.0  ;;  %s171_s4 = sshll.u32 %s276_s2, 4  ;;  %s172_s4 = int_to_ptr.vmem [resolvable:$true] %s171_s4 }
  0x92   :  { %117 = vadd.xlane.f32.xlu1 %v114_v23  ;;  %176 = dma.vmem_to_hbm [thread:$0]  %s172_s4, 16, %s174_s12, [#allocation5]  }
  0x99   :  { %115 = vadd.xlane.f32.xlu0 %v113_v24 }
  0xfc   :  { %v78_v25 = vpop.xlane.xlu0 %77 }
  0xfd   :  { %v81_v26 = vsub.f32 %v71_v17, %v78_v25 }
  0xff   :  { %v83_v27 = vmul.f32 1.442695, %v81_v26 }
 0x101   :  { %214 = vpow2.f32 %v83_v27 }
 0x104   :  { %v80_v28 = vpop.xlane.xlu0 %79 }
 0x105   :  { %v82_v29 = vsub.f32 %v73_v22, %v80_v28  ;;  %v118_v51 = vpop.xlane.xlu1 %117 }
 0x107   :  { %v215_v30 = vpop.eup %214  ;;  %v85_v31 = vmul.f32 1.442695, %v82_v29 }
 0x108   :  { %87 = vadd.xlane.f32.xlu2 %v215_v30 }
 0x109   :  { %216 = vpow2.f32 %v85_v31 }
 0x10c   :  { %v116_v47 = vpop.xlane.xlu0 %115 }
 0x10f   :  { %v217_v32 = vpop.eup %216 }
 0x110   :  { %89 = vadd.xlane.f32.xlu2 %v217_v32 }
 0x17b   :  { %v88_v37 = vpop.xlane.xlu2 %87 }
 0x17c   :  { %218 = vlog2.f32 %v88_v37 }
 0x182   :  { %v219_v41 = vpop.eup %218 }
 0x183   :  { %v92_v43 = vmul.f32 0.6931472, %v219_v41  ;;  %v90_v44 = vpop.xlane.xlu2 %89 }
 0x184   :  { %220 = vlog2.f32 %v90_v44 }
 0x185   :  { %v95_v45 = vadd.f32 %v92_v43, %v78_v25 }
 0x187   :  { %v124_v48 = vsub.f32 %v95_v45, %v116_v47 }
 0x189   :  { %v126_v52 = vmul.f32 %v325_v7, %v124_v48 }
 0x18a   :  { %v221_v46 = vpop.eup %220 }
 0x18b   :  { %v94_v49 = vmul.f32 0.6931472, %v221_v46  ;;  %v129_v55 = vsel %vm128_vm2, %v126_v52, 0.0 }
 0x18d   :  { %v96_v50 = vadd.f32 %v94_v49, %v80_v28 }
 0x18f   :  { %v125_v53 = vsub.f32 %v96_v50, %v118_v51 }
 0x191   :  { %v127_v54 = vmul.f32 %v327_v8, %v125_v53 }
 0x193   :  { %v130_v56 = vsel %vm128_vm2, %v127_v54, 0.0 }
 0x194   :  { %v131_v57 = vadd.f32 %v130_v56, %v129_v55 }
 0x196   :  { %v132_v58 = vrot.slane %v131_v57, 4 }
 0x198   :  { %v133_v59 = vadd.f32 %v132_v58, %v131_v57 }
 0x19a   :  { %v134_v60 = vrot.slane %v133_v59, 2 }
 0x19c   :  { %v135_v61 = vadd.f32 %v134_v60, %v133_v59 }
 0x19e   :  { %v136_v62 = vrot.slane %v135_v61, 1 }
 0x1a0   :  { %v137_v0 = vadd.f32 %v136_v62, %v135_v61 }
 0x1a2   :  { %v138_v1 = vadd.f32 %v137_v0, %v123_v63 }
 0x1a4   :  { %140 = vst.msk [vmem:[#allocation2] sm:$0x1] %vm27_vm6, %v138_v1 }
 0x1a5   :  { %165 = dma.vmem_to_hbm [thread:$0]  %s161_s13, 16, %s163_s16, [#allocation3]  }
 0x1a6   :  { %270 = dma.done.wait [#allocation3], 16  }
 0x1a7   :  { %271 = vsyncadd [#allocation3], 4294967280 }
 0x1a8   :  { %272 = dma.done.wait [#allocation5], 16  }
 0x1a9   :  { %273 = vsyncadd [#allocation5], 4294967280 }
 0x1aa   :  { %187 = vsyncpa [#allocation3], 1 }
 0x1ab   :  { %188 = vsyncpa [#allocation5], 1 }

// kernel: regularized_lm_forward.3
= control target key start
LH: loop header
LB: loop body
LE: loop exit
PB: predicated region body
PF: predicated region fallthrough
CT: control target
= control target key end

     0   :  { %16 = vsyncpa [#allocation3], 0  ;;  %s508_s0 = inlined_call_operand.vmem [shape: bf16[8,16], index: 0, kind: input, shape index: {}]   ;;  %s509_s1 = inlined_call_operand.vmem [shape: bf16[16,32], index: 1, kind: input, shape index: {}]   ;;  %s510_s2 = inlined_call_operand.vmem [shape: f32[1,32], index: 2, kind: input, shape index: {}]   ;;  %s511_s3 = inlined_call_operand.vmem [shape: bf16[32,128], index: 3, kind: input, shape index: {}]   ;;  %s512_s4 = inlined_call_operand.vmem [shape: f32[1,128], index: 4, kind: input, shape index: {}]   ;;  %s513_s5 = inlined_call_operand.vmem [shape: f32[8,128], index: 5, kind: input, shape index: {}]   ;;  %s514_s6 = inlined_call_operand.vmem [shape: s32[8,1], index: 6, kind: input, shape index: {}]   ;;  %s515_s7 = inlined_call_operand.hbm [shape: f32[8,128], index: 7, kind: output, shape index: {0}]   ;;  %s516_s8 = inlined_call_operand.hbm [shape: f32[1,1], index: 8, kind: output, shape index: {1}]   ;;  %s517_s9 = inlined_call_operand.hbm [shape: f32[1,1], index: 9, kind: output, shape index: {2}]   ;;  %s518_s10 = inlined_call_operand.hbm [shape: f32[1,1], index: 10, kind: output, shape index: {3}]  }
   0x1   :  { %17 = vsyncpa [#allocation5], 0  ;;  %v273_v0 = vld [vmem:[%s509_s1] sm:$0xff] }
   0x2   :  { %18 = vsyncpa [#allocation8], 0  ;;  %66 = vmatpush.bf16.msra.mxu0 %v273_v0  ;;  %v42_v1 = vld [vmem:[%s508_s0] sm:$0xf]  ;;  %vm55_vm0 = vcmask 130048   ;;  %v275_v2 = vld [vmem:[%s511_s3 + $0x8] sm:$0xff]  ;;  %v138_v27 = vlaneseq }
   0x3   :  { %104 = vmatpush.bf16.msra.mxu1 %v275_v2  ;;  %v274_v3 = vld [vmem:[%s511_s3] sm:$0xff]  ;;  %vm94_vm1 = vcmask 261120   ;;  %v400_v16 = vmov 0   ;;  %s202_s26 = sshll.u32 %s515_s7, 4  ;;  %vm38_vm4 = vcmask 0   ;;  %v402_v46 = vmov 0.0   ;;  %s203_s26 = int_to_ptr.hbm [resolvable:$true] %s202_s26 }
   0x4   :  { %v284_v4 = vld [vmem:[%s510_s2] ss:$0 sm:$0xff]  ;;  %282 = vset.pattern.permute.xlu2 %v400_v16  ;;  %283 = vset.pattern.permute.xlu0 %v400_v16  ;;  %v139_v29 = vand.u32 127, %v138_v27  ;;  %39 = vst.msk [vmem:[#allocation4] sm:$0x1] %vm38_vm4, %v402_v46  ;;  %vm152_vm5 = vcmask 7168  }
   0x5   :  { %262 = vmatmul.msk.bf16.vlgmr.msra.gmra.mxu0 %vm55_vm0, %v42_v1  ;;  %v285_v10 = vld [vmem:[%s512_s4] ss:$0 sm:$0xff]  ;;  %s401_s4 = smov [#allocation2]   ;;  %40 = vst.msk [vmem:[#allocation6] sm:$0x1] %vm38_vm4, %v402_v46  ;;  %s403_s7 = smov [#allocation7]  }
   0x6   :  { %v123_v14 = vld [vmem:[%s513_s5] sm:$0xff]  ;;  %s200_s5 = sshll.u32 %s401_s4, 4  ;;  %41 = vst.msk [vmem:[#allocation7] sm:$0x1] %vm38_vm4, %v402_v46  ;;  %s233_s27 = sshll.u32 %s403_s7, 4  ;;  %s201_s5 = int_to_ptr.vmem [resolvable:$true] %s200_s5  ;;  %s234_s27 = int_to_ptr.vmem [resolvable:$true] %s233_s27 }
   0x7   :  { %105 = vmatpush.bf16.msra.mxu1 %v274_v3  ;;  %v135_v15 = vld [vmem:[%s514_s6] sm:$0xff]  ;;  %s235_s30 = sshll.u32 %s518_s10, 4  ;;  %s404_s11 = smov [#allocation4]   ;;  %s236_s30 = int_to_ptr.hbm [resolvable:$true] %s235_s30 }
   0x8   :  { %vm136_vm2 = vcmp.ne.s32.totalorder %v135_v15, 4294967196  ;;  %s211_s12 = sshll.u32 %s404_s11, 4  ;;  %s213_s15 = sshll.u32 %s516_s8, 4  ;;  %s212_s12 = int_to_ptr.vmem [resolvable:$true] %s211_s12  ;;  %s214_s15 = int_to_ptr.hbm [resolvable:$true] %s213_s15 }
   0x9   :  { %v137_v17 = vsel %vm136_vm2, %v135_v15, 0  ;;  %v272_v47 = vsel %vm136_vm2, 1.0, %v402_v46  ;;  %s405_s8 = smov [#allocation6]   ;;  %s224_s18 = sshll.u32 %s517_s9, 4  ;;  %s225_s18 = int_to_ptr.hbm [resolvable:$true] %s224_s18 }
   0xa   :  { %141 = vperm.xlu2 %282, %v137_v17   ;;  %v186_v48 = vsel %vm152_vm5, %v272_v47, 0.0  ;;  %s222_s10 = sshll.u32 %s405_s8, 4  ;;  %s223_s10 = int_to_ptr.vmem [resolvable:$true] %s222_s10 }
   0xb   :  { %v187_v49 = vrot.slane %v186_v48, 4  ;;  %v149_v0 = vld [vmem:[#allocation4] sm:$0x1] }
   0xc   :  { %v174_v16 = vld [vmem:[#allocation6] sm:$0x1] }
   0xd   :  { %v188_v50 = vadd.f32 %v187_v49, %v186_v48  ;;  %v185_v2 = vld [vmem:[#allocation7] sm:$0x1] }
   0xf   :  { %v189_v52 = vrot.slane %v188_v50, 2 }
  0x11   :  { %v190_v55 = vadd.f32 %v189_v52, %v188_v50 }
  0x13   :  { %v191_v59 = vrot.slane %v190_v55, 1 }
  0x15   :  { %v192_v62 = vadd.f32 %v191_v59, %v190_v55 }
  0x17   :  { %v193_v3 = vadd.f32 %v192_v62, %v185_v2 }
  0x19   :  { %194 = vst.msk [vmem:[#allocation7] sm:$0x1] %vm38_vm4, %v193_v3 }
  0x1a   :  { %238 = dma.vmem_to_hbm [thread:$0]  %s234_s27, 16, %s236_s30, [#allocation8]  }
  0x64   :  { %v142_v32 = vpop.permute.xlu2 %141 }
  0x65   :  { %vm143_vm3 = vcmp.eq.s32.totalorder %v139_v29, %v142_v32 }
  0x82   :  { %v68_v5 = vpop.f32.mrf.mxu0 }
  0x83   :  { %v69_v6 = vadd.f32 %v284_v4, %v68_v5 }
  0x85   :  { %v72_v7 = vmax.f32 %v69_v6, 0.0 }
  0x87   :  { %v73_v8 = vpack.c.bf16 %v72_v7, %v72_v7 }
  0x89   :  { %271 = vmatmul.msk.bf16.vlgmr.msra.gmra.mxu1 %vm94_vm1, %v73_v8 }
  0x8a   :  { %v70_v9 = vpop.f32.mrf.mxu0 }
 0x106   :  { %v107_v11 = vpop.f32.mrf.mxu1 }
 0x107   :  { %v108_v12 = vadd.f32 %v285_v10, %v107_v11 }
 0x109   :  { %111 = vst [vmem:[#allocation2] sm:$0xff] %v108_v12  ;;  %112 = vmax.xlane.f32.xlu0 %v108_v12 }
 0x10a   :  { %205 = dma.vmem_to_hbm [thread:$0]  %s201_s5, 128, %s203_s26, [#allocation3]  }
 0x10e   :  { %v109_v13 = vpop.f32.mrf.mxu1 }
 0x111   :  { %124 = vmax.xlane.f32.xlu0 %v123_v14 }
 0x17c   :  { %v113_v18 = vpop.xlane.xlu0 %112 }
 0x17d   :  { %v114_v19 = vsub.f32 %v108_v12, %v113_v18 }
 0x17f   :  { %v115_v20 = vmul.f32 1.442695, %v114_v19 }
 0x181   :  { %286 = vpow2.f32 %v115_v20 }
 0x184   :  { %v125_v21 = vpop.xlane.xlu0 %124 }
 0x185   :  { %v126_v22 = vsub.f32 %v123_v14, %v125_v21 }
 0x187   :  { %v287_v23 = vpop.eup %286  ;;  %v127_v24 = vmul.f32 1.442695, %v126_v22 }
 0x188   :  { %117 = vadd.xlane.f32.xlu1 %v287_v23 }
 0x189   :  { %288 = vpow2.f32 %v127_v24 }
 0x18f   :  { %v289_v25 = vpop.eup %288 }
 0x190   :  { %129 = vadd.xlane.f32.xlu1 %v289_v25 }
 0x1fb   :  { %v118_v26 = vpop.xlane.xlu1 %117 }
 0x1fc   :  { %290 = vlog2.f32 %v118_v26 }
 0x202   :  { %v291_v28 = vpop.eup %290 }
 0x203   :  { %v120_v30 = vmul.f32 0.6931472, %v291_v28  ;;  %v130_v31 = vpop.xlane.xlu1 %129 }
 0x204   :  { %292 = vlog2.f32 %v130_v31 }
 0x205   :  { %v121_v33 = vadd.f32 %v120_v30, %v113_v18 }
 0x207   :  { %v122_v34 = vsub.f32 %v108_v12, %v121_v33 }
 0x209   :  { %v144_v35 = vsel %vm143_vm3, %v122_v34, 0.0  ;;  %v164_v41 = vmax.f32 %v122_v34, -40.0 }
 0x20a   :  { %v293_v36 = vpop.eup %292  ;;  %145 = vadd.xlane.f32.xlu0 %v144_v35 }
 0x20b   :  { %v132_v37 = vmul.f32 0.6931472, %v293_v36 }
 0x20d   :  { %v133_v38 = vadd.f32 %v132_v37, %v125_v21 }
 0x20f   :  { %v134_v39 = vsub.f32 %v123_v14, %v133_v38 }
 0x211   :  { %v163_v40 = vmax.f32 %v134_v39, -40.0 }
 0x213   :  { %v165_v42 = vadd.f32 %v164_v41, %v163_v40 }
 0x215   :  { %v166_v43 = vmul.f32 0.5, %v165_v42 }
 0x217   :  { %v167_v44 = vmul.f32 1.442695, %v166_v43 }
 0x219   :  { %294 = vpow2.f32 %v167_v44 }
 0x21f   :  { %v295_v45 = vpop.eup %294 }
 0x220   :  { %169 = vadd.xlane.f32.xlu2 %v295_v45 }
 0x27d   :  { %v146_v51 = vpop.xlane.xlu0 %145 }
 0x27e   :  { %v150_v53 = vsub.f32 0.0, %v146_v51 }
 0x280   :  { %v151_v54 = vmul.f32 %v272_v47, %v150_v53 }
 0x282   :  { %v153_v56 = vsel %vm152_vm5, %v151_v54, 0.0 }
 0x283   :  { %v154_v57 = vrot.slane %v153_v56, 4 }
 0x285   :  { %v155_v58 = vadd.f32 %v154_v57, %v153_v56 }
 0x287   :  { %v156_v60 = vrot.slane %v155_v58, 2 }
 0x289   :  { %v157_v61 = vadd.f32 %v156_v60, %v155_v58 }
 0x28b   :  { %v158_v63 = vrot.slane %v157_v61, 1 }
 0x28d   :  { %v159_v1 = vadd.f32 %v158_v63, %v157_v61 }
 0x28f   :  { %v160_v4 = vadd.f32 %v159_v1, %v149_v0 }
 0x291   :  { %162 = vst.msk [vmem:[#allocation4] sm:$0x1] %vm38_vm4, %v160_v4 }
 0x292   :  { %216 = dma.vmem_to_hbm [thread:$0]  %s212_s12, 16, %s214_s15, [#allocation5]  }
 0x293   :  { %v170_v5 = vpop.xlane.xlu2 %169 }
 0x294   :  { %296 = vlog2.f32 %v170_v5 }
 0x29a   :  { %v297_v6 = vpop.eup %296 }
 0x29b   :  { %v172_v7 = vmul.f32 0.6931472, %v297_v6 }
 0x29d   :  { %v173_v8 = vsub.f32 0.0, %v172_v7 }
 0x29f   :  { %v175_v9 = vmul.f32 %v272_v47, %v173_v8 }
 0x2a1   :  { %v176_v10 = vsel %vm152_vm5, %v175_v9, 0.0 }
 0x2a2   :  { %v177_v11 = vrot.slane %v176_v10, 4 }
 0x2a4   :  { %v178_v12 = vadd.f32 %v177_v11, %v176_v10 }
 0x2a6   :  { %v179_v13 = vrot.slane %v178_v12, 2 }
 0x2a8   :  { %v180_v14 = vadd.f32 %v179_v13, %v178_v12 }
 0x2aa   :  { %v181_v15 = vrot.slane %v180_v14, 1 }
 0x2ac   :  { %v182_v17 = vadd.f32 %v181_v15, %v180_v14 }
 0x2ae   :  { %v183_v18 = vadd.f32 %v182_v17, %v174_v16 }
 0x2b0   :  { %184 = vst.msk [vmem:[#allocation6] sm:$0x1] %vm38_vm4, %v183_v18 }
 0x2b1   :  { %227 = dma.vmem_to_hbm [thread:$0]  %s223_s10, 16, %s225_s18, [#allocation5]  }
 0x2b2   :  { %394 = dma.done.wait [#allocation3], 128  }
 0x2b3   :  { %395 = vsyncadd [#allocation3], 4294967168 }
 0x2b4   :  { %396 = dma.done.wait [#allocation5], 32  }
 0x2b5   :  { %397 = vsyncadd [#allocation5], 4294967264 }
 0x2b6   :  { %398 = dma.done.wait [#allocation8], 16  }
 0x2b7   :  { %399 = vsyncadd [#allocation8], 4294967280 }
 0x2b8   :  { %255 = vsyncpa [#allocation3], 1 }
 0x2b9   :  { %256 = vsyncpa [#allocation5], 1 }
 0x2ba   :  { %257 = vsyncpa [#allocation8], 1 }

</bundles_post_ra>
